<compile_context>
chip_gen: v7x
topology: tpu7x:2x2x1
jax: 0.10.0
libtpu: 0.0.40
codegen_flags: <defaults>
</compile_context>

<pallas_src>
import functools

import jax
import jax.numpy as jnp
from jax import lax
from jax.experimental import pallas as pl
from jax.experimental.pallas import tpu as pltpu


def _round_up(n, m):
    return ((n + m - 1) // m) * m


def _probe_kernel_resident(x_ref, w_ref, b_ref, o_ref, *, eps):
    # Native-dtype operands straight into the MXU; f32 accumulation.
    y = jnp.dot(x_ref[...], w_ref[...], preferred_element_type=jnp.float32)
    y = y + b_ref[...]  # bias pre-cast to f32 in the wrapper
    # F.normalize: x / max(||x||, eps) == x * rsqrt(max(||x||^2, eps^2))
    ss = jnp.sum(y * y, axis=-1, keepdims=True)
    o_ref[...] = (y * lax.rsqrt(jnp.maximum(ss, eps * eps))).astype(o_ref.dtype)


def _probe_kernel_ktiled(x_ref, w_ref, b_ref, o_ref, acc_ref, *, eps):
    # Fallback for large D: contraction (K) axis tiled, f32 VMEM accumulator.
    k = pl.program_id(1)

    @pl.when(k == 0)
    def _():
        acc_ref[...] = jnp.zeros_like(acc_ref)

    acc_ref[...] += jnp.dot(x_ref[...], w_ref[...],
                            preferred_element_type=jnp.float32)

    @pl.when(k == pl.num_programs(1) - 1)
    def _():
        y = acc_ref[...] + b_ref[...]
        ss = jnp.sum(y * y, axis=-1, keepdims=True)
        o_ref[...] = (y * lax.rsqrt(jnp.maximum(ss, eps * eps))).astype(o_ref.dtype)


def _vmem_cap_bytes():
    """~75% of physical VMEM; falls back to the smallest (v7x, 64 MiB) if unknown."""
    try:
        phys = int(pltpu.get_tpu_info().vmem_capacity_bytes)
    except Exception:
        phys = 64 << 20
    return max(48 << 20, (phys * 3) // 4)


def linear_probe_head(x, weight, bias, *, tb=512, eps=1e-12, out_dtype=jnp.float32):
    """Computes F.normalize(x @ weight.T + bias, dim=-1).

    x:      (B, D) features from the frozen backbone (already .float() upstream).
    weight: (D, D) PyTorch Linear weight (out_features, in_features).
    bias:   (D,)   PyTorch Linear bias.
    """
    B, D = x.shape
    assert weight.shape == (D, D)
    assert bias.shape == (D,)

    # One-time host-side prep (hoist out of the hot path if calling repeatedly):
    #  * transpose PyTorch (out, in) weight -> (in, out) so the kernel does x @ W
    #  * cast bias to f32 once (epilogue math is f32)
    #  * zero-pad the feature dim to a multiple of 128 (lane-dense unmasked
    #    stores; zero columns leave the L2 norm unchanged).
    Dp = _round_up(D, 128)
    w_t = jnp.transpose(weight)
    b_row = bias.reshape(1, D).astype(jnp.float32)
    if Dp != D:
        x = jnp.pad(x, ((0, 0), (0, Dp - D)))
        w_t = jnp.pad(w_t, ((0, Dp - D), (0, Dp - D)))
        b_row = jnp.pad(b_row, ((0, 0), (0, Dp - D)))

    x_isz = jnp.dtype(x.dtype).itemsize
    w_isz = jnp.dtype(w_t.dtype).itemsize
    o_isz = jnp.dtype(out_dtype).itemsize

    # Dtype-aware sublane multiple: f32 -> 8, bf16 -> 16, int8/fp8 -> 32.
    sub = {4: 8, 2: 16, 1: 32}.get(x_isz, 8)
    vmem_cap = _vmem_cap_bytes()

    # Initial batch tile: large (HBM-roofline sweet spot), clamped to batch.
    tb = max(sub, _round_up(min(tb, B), sub))

    # ---- Path A: full (Dp, Dp) weight resident in VMEM --------------------
    def footprint_resident(tb_):
        return (2 * tb_ * Dp * x_isz          # x tile, double-buffered
                + 2 * tb_ * Dp * o_isz        # out tile, double-buffered
                + 2 * Dp * Dp * w_isz         # weight (pipeline double-buffers it)
                + 2 * Dp * 4)                 # bias

    tb_a = tb
    while footprint_resident(tb_a) > vmem_cap and tb_a > sub:
        tb_a = max(sub, _round_up(tb_a // 2, sub))
    use_resident = footprint_resident(tb_a) <= vmem_cap

    # ---- Path B: K-tiled contraction with f32 accumulator -----------------
    def _largest_div_tile(total_blocks, max_blocks):
        d = max(1, min(max_blocks, total_blocks))
        while total_blocks % d != 0:
            d -= 1
        return d

    tk = 128 * _largest_div_tile(Dp // 128, 4)   # <= 512, divides Dp

    def footprint_ktiled(tb_, tk_):
        return (2 * tb_ * tk_ * x_isz
                + 2 * tk_ * Dp * w_isz
                + 2 * Dp * 4
                + 2 * tb_ * Dp * o_isz
                + tb_ * Dp * 4)                  # acc scratch

    if use_resident:
        tb = tb_a
        footprint = footprint_resident(tb)
    else:
        tb_b = tb
        while footprint_ktiled(tb_b, tk) > vmem_cap and tb_b > sub:
            tb_b = max(sub, _round_up(tb_b // 2, sub))
        tb = tb_b
        footprint = footprint_ktiled(tb, tk)

    # Load-balance the "parallel" batch axis across 2 TensorCores (v7x):
    # prefer an even (>=2) number of batch blocks when the batch allows it.
    if B >= 2 * sub:
        nb = pl.cdiv(B, tb)
        if nb < 2:
            tb = max(sub, _round_up(pl.cdiv(B, 2), sub))
        elif nb % 2 == 1:
            tb_alt = max(sub, _round_up(pl.cdiv(B, nb + 1), sub))
            if pl.cdiv(B, tb_alt) % 2 == 0:
                tb = tb_alt
    nb = pl.cdiv(B, tb)

    vmem_limit = int(min(max(footprint + (4 << 20), 32 << 20), vmem_cap))

    if use_resident:
        out = pl.pallas_call(
            functools.partial(_probe_kernel_resident, eps=eps),
            out_shape=jax.ShapeDtypeStruct((B, Dp), out_dtype),
            grid_spec=pltpu.PrefetchScalarGridSpec(
                num_scalar_prefetch=0,
                grid=(nb,),
                in_specs=[
                    pl.BlockSpec((tb, Dp), lambda i: (i, 0)),   # x batch tile
                    pl.BlockSpec((Dp, Dp), lambda i: (0, 0)),   # weight, resident
                    pl.BlockSpec((1, Dp), lambda i: (0, 0)),    # bias, resident
                ],
                out_specs=pl.BlockSpec((tb, Dp), lambda i: (i, 0)),
            ),
            compiler_params=pltpu.CompilerParams(
                dimension_semantics=("parallel",),
                vmem_limit_bytes=vmem_limit,
            ),
        )(x, w_t, b_row)
    else:
        nk = Dp // tk
        out = pl.pallas_call(
            functools.partial(_probe_kernel_ktiled, eps=eps),
            out_shape=jax.ShapeDtypeStruct((B, Dp), out_dtype),
            grid_spec=pltpu.PrefetchScalarGridSpec(
                num_scalar_prefetch=0,
                grid=(nb, nk),
                in_specs=[
                    pl.BlockSpec((tb, tk), lambda i, k: (i, k)),   # x (batch, K) tile
                    pl.BlockSpec((tk, Dp), lambda i, k: (k, 0)),   # weight K-slab
                    pl.BlockSpec((1, Dp), lambda i, k: (0, 0)),    # bias, resident
                ],
                out_specs=pl.BlockSpec((tb, Dp), lambda i, k: (i, 0)),
                scratch_shapes=[pltpu.VMEM((tb, Dp), jnp.float32)],
            ),
            compiler_params=pltpu.CompilerParams(
                dimension_semantics=("parallel", "arbitrary"),
                vmem_limit_bytes=vmem_limit,
            ),
        )(x, w_t, b_row)

    if Dp != D:
        out = out[:, :D]
    return out


if __name__ == "__main__":
    batch = 8
    feat_dim = 32

    key = jax.random.PRNGKey(0)
    # Stand-in for `model(images).float()` backbone features.
    x = jax.random.normal(key, (batch, feat_dim), dtype=jnp.float32)

    # Deterministic parameter init matching the PyTorch module:
    # mapper.weight = I, mapper.bias = 0.
    weight = jnp.eye(feat_dim, dtype=jnp.float32)
    bias = jnp.zeros((feat_dim,), dtype=jnp.float32)

    out = linear_probe_head(x, weight, bias)
    jax.block_until_ready(out)

    # Reference: normalize(x @ W.T + b, dim=-1) with eps=1e-12.
    y_ref = x @ weight.T + bias
    norm = jnp.sqrt(jnp.sum(y_ref * y_ref, axis=-1, keepdims=True))
    ref = y_ref / jnp.maximum(norm, 1e-12)

    assert out.shape == (batch, feat_dim)
    assert jnp.allclose(out, ref, atol=1e-6, rtol=1e-5), "mismatch vs reference"

    print("KERNEL_OK")
</pallas_src>

<mosaic_0001>
module attributes {stable_mosaic.version = 11 : i64} {
  func.func @_probe_kernel_resident(%arg0: i32, %arg1: memref<8x128xf32, #tpu.memory_space<vmem>>, %arg2: memref<128x128xf32, #tpu.memory_space<vmem>>, %arg3: memref<1x128xf32, #tpu.memory_space<vmem>>, %arg4: memref<8x128xf32, #tpu.memory_space<vmem>>) attributes {dimension_semantics = [#tpu.dimension_semantics<parallel>], iteration_bounds = array<i64: 1>, scalar_prefetch = 0 : i64, scratch_operands = 0 : i64, tpu.core_type = #tpu.core_type<tc>, window_params = [{transform_indices = @transform_0, window_bounds = array<i64: 8, 128>}, {pipeline_mode = #tpu.pipeline_mode<synchronous>, transform_indices = @transform_1, window_bounds = array<i64: 128, 128>}, {pipeline_mode = #tpu.pipeline_mode<synchronous>, transform_indices = @transform_2, window_bounds = array<i64: 1, 128>}, {transform_indices = @transform_3, window_bounds = array<i64: 8, 128>}]} {
    %c0 = arith.constant 0 : index
    %c0_0 = arith.constant 0 : index
    %0 = vector.load %arg1[%c0, %c0_0] : memref<8x128xf32, #tpu.memory_space<vmem>>, vector<8x128xf32>
    %c0_1 = arith.constant 0 : index
    %c0_2 = arith.constant 0 : index
    %1 = vector.load %arg2[%c0_1, %c0_2] : memref<128x128xf32, #tpu.memory_space<vmem>>, vector<128x128xf32>
    %cst = arith.constant dense<0.000000e+00> : vector<8x128xf32>
    %2 = tpu.matmul %0, %1, %cst {dimension_numbers = #tpu.dot_dimension_numbers<[1], [0], [0], [1], [0, 0, 1, 1], [], []>} : vector<8x128xf32>, vector<128x128xf32>, vector<8x128xf32> -> vector<8x128xf32>
    %c0_3 = arith.constant 0 : index
    %c0_4 = arith.constant 0 : index
    %3 = vector.load %arg3[%c0_3, %c0_4] : memref<1x128xf32, #tpu.memory_space<vmem>>, vector<1x128xf32>
    %4 = vector.broadcast %3 : vector<1x128xf32> to vector<8x128xf32>
    %5 = arith.addf %2, %4 : vector<8x128xf32>
    %6 = arith.mulf %5, %5 : vector<8x128xf32>
    %cst_5 = arith.constant dense<0.000000e+00> : vector<8xf32>
    %7 = vector.multi_reduction <add>, %6, %cst_5 [1] : vector<8x128xf32> to vector<8xf32>
    %8 = vector.shape_cast %7 : vector<8xf32> to vector<8x1xf32>
    %cst_6 = arith.constant 1.000000e-24 : f32
    %9 = vector.broadcast %cst_6 : f32 to vector<8x1xf32>
    %10 = arith.maximumf %8, %9 : vector<8x1xf32>
    %11 = math.rsqrt %10 : vector<8x1xf32>
    %12 = vector.broadcast %11 : vector<8x1xf32> to vector<8x128xf32>
    %13 = arith.mulf %5, %12 : vector<8x128xf32>
    %c0_7 = arith.constant 0 : index
    %c0_8 = arith.constant 0 : index
    %14 = vector.load %arg4[%c0_7, %c0_8] : memref<8x128xf32, #tpu.memory_space<vmem>>, vector<8x128xf32>
    tpu.vector_store %arg4[%c0_7, %c0_8], %13 {strides = array<i32>} : memref<8x128xf32, #tpu.memory_space<vmem>>, vector<8x128xf32>,
    return
  }
  func.func @transform_0(%arg0: i32) -> (i32, i32) {
    %c0_i32 = arith.constant 0 : i32
    %c0_i32_0 = arith.constant 0 : i32
    return %arg0, %c0_i32 : i32, i32
  }
  func.func @transform_1(%arg0: i32) -> (i32, i32) {
    %c0_i32 = arith.constant 0 : i32
    %c0_i32_0 = arith.constant 0 : i32
    %c0_i32_1 = arith.constant 0 : i32
    return %c0_i32, %c0_i32_0 : i32, i32
  }
  func.func @transform_2(%arg0: i32) -> (i32, i32) {
    %c0_i32 = arith.constant 0 : i32
    %c0_i32_0 = arith.constant 0 : i32
    %c0_i32_1 = arith.constant 0 : i32
    return %c0_i32, %c0_i32_0 : i32, i32
  }
  func.func @transform_3(%arg0: i32) -> (i32, i32) {
    %c0_i32 = arith.constant 0 : i32
    %c0_i32_0 = arith.constant 0 : i32
    return %arg0, %c0_i32 : i32, i32
  }
}

</mosaic_0001>

<bundles_post_ra>
// kernel: tpu_custom_call.1
= control target key start
LH: loop header
LB: loop body
LE: loop exit
PB: predicated region body
PF: predicated region fallthrough
CT: control target
= control target key end

     0   :  { %8 = vsyncpa [#allocation3], 0  ;;  %s391_s0 = inlined_call_operand.hbm [shape: f32[8,128], index: 0, kind: input, shape index: {}]   ;;  %s392_s1 = inlined_call_operand.hbm [shape: f32[128,128], index: 1, kind: input, shape index: {}]   ;;  %s393_s2 = inlined_call_operand.vmem [shape: f32[1,128], index: 2, kind: input, shape index: {}]   ;;  %s394_s3 = inlined_call_operand.hbm [shape: f32[8,128], index: 3, kind: output, shape index: {}]  }
   0x1   :  { %9 = vsyncpa [#allocation6], 0 }
   0x2   :  { %10 = vsyncpa [#allocation4], 0  ;;  %s317_s12 = smov [#allocation2]   ;;  %s318_s14 = smov [#allocation5]  }
   0x3   :  { %s17_s13 = sshll.u32 %s317_s12, 4  ;;  %s26_s15 = sshll.u32 %s318_s14, 4  ;;  %s18_s13 = int_to_ptr.vmem [resolvable:$true] %s17_s13  ;;  %s345_s15 = int_to_ptr.vmem [resolvable:$true] %s26_s15 }
   0x4   :  { %s245_s18 = scalar_lea.hbm %s391_s0, 128 }
   0x5   :  { %p246_p0 = scmp.ne.s32.totalorder %s391_s0, %s245_s18  ;;  %p249_p1 = scmp.lt.u32.totalorder %s245_s18, %s391_s0 }
   0x7   :  { %p251_p2 = pnand %p249_p1, %p246_p0 }
   0x9   :  { %254 = shalt.err (!%p251_p2)
}
   0xa   :  { %s255_s23 = scalar_lea.vmem %s18_s13, 128  ;;  %p260_p4 = scmp.lt.s32.totalorder %s18_s13, %s18_s13 }
   0xb   :  { %p256_p3 = scmp.ne.s32.totalorder %s18_s13, %s255_s23  ;;  %p261_p5 = scmp.lt.s32.totalorder %s255_s23, %s255_s23 }
   0xd   :  { %p262_p6 = por %p261_p5, %p260_p4 }
   0xf   :  { %p263_p7 = pnand %p262_p6, %p256_p3 }
  0x11   :  { %266 = shalt.err (!%p263_p7)
}
  0x12   :  { %20 = dma.hbm_to_vmem [thread:$0]  %s391_s0, 128, %s18_s13, [#allocation3]  }
  0x13   :  { %s267_s28 = scalar_lea.hbm %s392_s1, 2048 }
  0x14   :  { %p268_p8 = scmp.ne.s32.totalorder %s392_s1, %s267_s28  ;;  %p271_p9 = scmp.lt.u32.totalorder %s267_s28, %s392_s1 }
  0x16   :  { %p273_p10 = pnand %p271_p9, %p268_p8 }
  0x18   :  { %276 = shalt.err (!%p273_p10)
}
  0x19   :  { %s277_s6 = scalar_lea.vmem %s345_s15, 2048  ;;  %p282_p12 = scmp.lt.s32.totalorder %s345_s15, %s345_s15 }
  0x1a   :  { %p278_p11 = scmp.ne.s32.totalorder %s345_s15, %s277_s6  ;;  %p283_p13 = scmp.lt.s32.totalorder %s277_s6, %s277_s6 }
  0x1c   :  { %p284_p0 = por %p283_p13, %p282_p12 }
  0x1e   :  { %p285_p1 = pnand %p284_p0, %p278_p11 }
  0x20   :  { %288 = shalt.err (!%p285_p1)
}
  0x21   :  { %s319_s0 = smov 128   ;;  %s320_s7 = smov 8  }
  0x22   :  { %32 = dma.hbm_to_vmem [thread:$0]  %s392_s1, 2048, %s345_s15, [#allocation6], %s319_s0, %s319_s0, %s320_s7  }
  0x23   :  { %311 = dma.done.wait [#allocation3], 128  }
  0x24   :  { %312 = vsyncadd [#allocation3], 4294967168 }
  0x25   :  { %313 = dma.done.wait [#allocation6], 2048  }
  0x26   :  { %314 = vsyncadd [#allocation6], 4294965248  ;;  %v321_v0 = vmov 0.0|0.0   ;;  %vm322_vm0 = vmmov 0   ;;  %v323_v1 = vmov 0.0   ;;  %v42_v2 = vld [vmem:[#allocation5] sm:$0xff] }
  0x27   :  { %211 = vmatprep.subr.bf16.mxu0 %v321_v0  ;;  %208 = vmatprep.mubr.msk.f32.mxu0 %vm322_vm0, %v323_v1  ;;  %v43_v3 = vld [vmem:[#allocation5 + $0x8] sm:$0xff]  ;;  %v44_v4 = vld [vmem:[#allocation5 + $0x10] sm:$0xff]  ;;  %v45_v6 = vld [vmem:[#allocation5 + $0x18] sm:$0xff]  ;;  %s324_s11 = smov [#allocation7]  }
  0x28   :  { %v212_v5 = vpack.c.bf16 %v43_v3, %v42_v2  ;;  %v215_v7 = vpack.c.bf16 %v45_v6, %v44_v4  ;;  %v46_v8 = vld [vmem:[#allocation5 + $0x20] sm:$0xff]  ;;  %v47_v9 = vld [vmem:[#allocation5 + $0x28] sm:$0xff]  ;;  %v48_v11 = vld [vmem:[#allocation5 + $0x30] sm:$0xff]  ;;  %s148_s12 = sshll.u32 %s324_s11, 4  ;;  %s149_s12 = int_to_ptr.vmem [resolvable:$true] %s148_s12 }
  0x29   :  { %v218_v10 = vpack.c.bf16 %v47_v9, %v46_v8  ;;  %v49_v12 = vld [vmem:[#allocation5 + $0x38] sm:$0xff]  ;;  %v50_v14 = vld [vmem:[#allocation5 + $0x40] sm:$0xff]  ;;  %v51_v15 = vld [vmem:[#allocation5 + $0x48] sm:$0xff]  ;;  %s289_s13 = scalar_lea.vmem %s149_s12, 128  ;;  %p294_p3 = scmp.lt.s32.totalorder %s149_s12, %s149_s12 }
  0x2a   :  { %213 = vmatpush3.bf16.msra.mxu0 %v212_v5  ;;  %v221_v13 = vpack.c.bf16 %v49_v12, %v48_v11  ;;  %v224_v16 = vpack.c.bf16 %v51_v15, %v50_v14  ;;  %v52_v17 = vld [vmem:[#allocation5 + $0x50] sm:$0xff]  ;;  %v53_v18 = vld [vmem:[#allocation5 + $0x58] sm:$0xff]  ;;  %v54_v20 = vld [vmem:[#allocation5 + $0x60] sm:$0xff]  ;;  %p290_p2 = scmp.ne.s32.totalorder %s149_s12, %s289_s13  ;;  %p295_p4 = scmp.lt.s32.totalorder %s289_s13, %s289_s13 }
  0x2b   :  { %214 = vmatprep.subr.bf16.mxu0 %v321_v0  ;;  %v227_v19 = vpack.c.bf16 %v53_v18, %v52_v17  ;;  %v55_v21 = vld [vmem:[#allocation5 + $0x68] sm:$0xff]  ;;  %v56_v23 = vld [vmem:[#allocation5 + $0x70] sm:$0xff]  ;;  %v57_v24 = vld [vmem:[#allocation5 + $0x78] sm:$0xff] }
  0x2c   :  { %v230_v22 = vpack.c.bf16 %v55_v21, %v54_v20  ;;  %v233_v25 = vpack.c.bf16 %v57_v24, %v56_v23  ;;  %v41_v26 = vld [vmem:[#allocation2] sm:$0xff]  ;;  %p296_p5 = por %p295_p4, %p294_p3 }
  0x2d   :  { %v158_v27 = vld [vmem:[%s393_s2] ss:$0 sm:$0xff] }
  0x2e   :  { %216 = vmatpush3.bf16.msra.mxu0 %v215_v7  ;;  %p297_p6 = pnand %p296_p5, %p290_p2 }
  0x2f   :  { %217 = vmatprep.subr.bf16.mxu0 %v321_v0 }
  0x32   :  { %219 = vmatpush3.bf16.msra.mxu0 %v218_v10 }
  0x33   :  { %220 = vmatprep.subr.bf16.mxu0 %v321_v0 }
  0x36   :  { %222 = vmatpush3.bf16.msra.mxu0 %v221_v13 }
  0x37   :  { %223 = vmatprep.subr.bf16.mxu0 %v321_v0 }
  0x3a   :  { %225 = vmatpush3.bf16.msra.mxu0 %v224_v16 }
  0x3b   :  { %226 = vmatprep.subr.bf16.mxu0 %v321_v0 }
  0x3e   :  { %228 = vmatpush3.bf16.msra.mxu0 %v227_v19 }
  0x3f   :  { %229 = vmatprep.subr.bf16.mxu0 %v321_v0 }
  0x42   :  { %231 = vmatpush3.bf16.msra.mxu0 %v230_v22 }
  0x43   :  { %232 = vmatprep.subr.bf16.mxu0 %v321_v0 }
  0x46   :  { %234 = vmatpush3.bf16.msra.mxu0 %v233_v25 }
  0x49   :  { %209 = vmatmul.mubr.f32.vlgmr.msra.gmra.mrb[0].mxu0 %v41_v26 }
 0x11c   :  { %v131_v28 = vpop.f32.mrb[0].mxu0 }
 0x11d   :  { %v132_v29 = vadd.f32 %v158_v27, %v131_v28  ;;  %v210_v30 = vpop.f32.mrb[1].mxu0 }
 0x11f   :  { %v135_v31 = vmul.f32 %v132_v29, %v132_v29 }
 0x121   :  { %136 = vadd.xlane.f32.xlu0 %v135_v31 }
 0x1ae   :  { %v137_v32 = vpop.xlane.xlu0 %136 }
 0x1af   :  { %v138_v33 = vmax.f32 %v137_v32, 1e-24 }
 0x1b1   :  { %243 = vrsqrt.f32 %v138_v33 }
 0x1bb   :  { %v244_v34 = vpop.eup %243 }
 0x1bc   :  { %v140_v35 = vmul.f32 %v244_v34, %v132_v29 }
 0x1be   :  { %141 = vst [vmem:[#allocation7] sm:$0xff] %v140_v35 }
 0x1bf   :  { %300 = shalt.err (!%p297_p6)
}
 0x1c0   :  { %s301_s15 = scalar_lea.hbm %s394_s3, 128 }
 0x1c1   :  { %p302_p7 = scmp.ne.s32.totalorder %s394_s3, %s301_s15  ;;  %p305_p8 = scmp.lt.u32.totalorder %s301_s15, %s394_s3 }
 0x1c3   :  { %p307_p9 = pnand %p305_p8, %p302_p7 }
 0x1c5   :  { %310 = shalt.err (!%p307_p9)
}
 0x1c6   :  { %151 = dma.vmem_to_hbm [thread:$0]  %s149_s12, 128, %s394_s3, [#allocation4]  }
 0x1c7   :  { %315 = dma.done.wait [#allocation4], 128  }
 0x1c8   :  { %316 = vsyncadd [#allocation4], 4294967168 }
 0x1c9   :  { %155 = vsyncpa [#allocation3], 1 }
 0x1ca   :  { %156 = vsyncpa [#allocation6], 1 }
 0x1cb   :  { %157 = vsyncpa [#allocation4], 1 }

</bundles_post_ra>
